<compile_context>
chip_gen: v5e
topology: v5e:2x2
jax: 0.10.0
libtpu: 0.0.40
codegen_flags: <defaults>
</compile_context>

<pallas_src>
import numpy as np
import jax
import jax.numpy as jnp
from jax.experimental import pallas as pl
from jax.experimental.pallas import tpu as pltpu

LANES = 128


def _round_up(n: int, m: int) -> int:
    return ((n + m - 1) // m) * m


# ----------------------------------------------------------------------------
# Fused kernel: per-tap accumulated conv matmuls + masked max-pool,
# one fused Bi-LSTM gate matmul, one FC matmul.  2 inputs, 1 output.
# ----------------------------------------------------------------------------
def _build_kernel(*, B, T, K_eff, D, H, offs, mm_dtype, apply_mask):
    def kernel(x_ref, p_ref, out_ref):
        # ---- all CNN branches: K_eff accumulated per-tap matmuls -----------
        w0 = offs["w_conv"]
        acc = None
        for j in range(K_eff):                              # static unroll
            xj = x_ref[:, j:j + T, :].reshape(B * T, D).astype(mm_dtype)
            wj = p_ref[w0 + j * D:w0 + (j + 1) * D, :].astype(mm_dtype)
            part = jnp.dot(xj, wj, preferred_element_type=jnp.float32)
            acc = part if acc is None else acc + part       # (B*T, 128) f32

        b_conv = p_ref[offs["b_conv"]:offs["b_conv"] + 1, :]          # f32
        act = jnp.maximum(acc + b_conv, 0.0).reshape(B, T, LANES)     # ReLU
        if apply_mask:
            # constant 0/1 mask (rows of the blob): zeroes positions past each
            # branch's valid conv length.  ReLU output >= 0 so zeros never win
            # the max over valid positions.
            mask = p_ref[offs["mask"]:offs["mask"] + T, :]            # (T,128)
            act = act * mask
        feats = jnp.max(act, axis=1)                                  # (B, 128)

        # ---- Bi-LSTM single step (h0=c0=0): ONE matmul for all 6 gates ----
        # column order [i_f | i_b | g_f | g_b | o_f | o_b]
        w_g = p_ref[offs["w_gates"]:offs["w_gates"] + LANES, :].astype(mm_dtype)
        b_g = p_ref[offs["b_gates"]:offs["b_gates"] + 1, :]
        gates = jnp.dot(feats.astype(mm_dtype), w_g,
                        preferred_element_type=jnp.float32) + b_g     # (B,128)
        i_gate = jax.nn.sigmoid(gates[:, 0:2 * H])        # [i_fwd | i_bwd]
        g_gate = jnp.tanh(gates[:, 2 * H:4 * H])          # [g_fwd | g_bwd]
        o_gate = jax.nn.sigmoid(gates[:, 4 * H:6 * H])    # [o_fwd | o_bwd]
        h = o_gate * jnp.tanh(i_gate * g_gate)            # (B,2H)=[h_fwd|h_bwd]

        # ---- FC head, lane-dense output (num_classes zero-padded to 128) ---
        w_fc = p_ref[offs["w_fc"]:offs["w_fc"] + 2 * H, :].astype(mm_dtype)
        b_fc = p_ref[offs["b_fc"]:offs["b_fc"] + 1, :]
        logits = jnp.dot(h.astype(mm_dtype), w_fc,
                         preferred_element_type=jnp.float32) + b_fc   # (B,128)
        out_ref[...] = logits.astype(out_ref.dtype)

    return kernel


# ----------------------------------------------------------------------------
# Host-side packing (runs ONCE per parameter set, pure numpy — no XLA ops).
# ----------------------------------------------------------------------------
def _pack_weight_sections(params, cnn_kernel_sizes, *, D, F, H, P_eff, K_eff):
    NB = len(cnn_kernel_sizes)
    KD = K_eff * D

    # Fused conv weight (KD, NB*F): branch bi lives in lanes [bi*F,(bi+1)*F);
    # tap j of a (k, pad p) branch sits at rows [(P_eff-p+j)*D, +D).
    w_blocks, b_blocks = [], []
    for k, w, b in zip(cnn_kernel_sizes, params["conv_w"], params["conv_b"]):
        p = (k - 1) // 2
        off = P_eff - p
        w = np.asarray(w, np.float32)                       # (F, D, k)
        wk = np.transpose(w, (2, 1, 0)).reshape(k * D, F)   # [(j*D+d), f]=w[f,d,j]
        blk = np.zeros((KD, F), np.float32)
        blk[off * D:(off + k) * D, :] = wk
        w_blocks.append(blk)
        b_blocks.append(np.asarray(b, np.float32))
    w_conv = np.concatenate(w_blocks, axis=1)               # (KD, NB*F)
    b_conv = np.concatenate(b_blocks)[None, :]              # (1, NB*F)

    # Fused LSTM gate weights, column order [i_f | i_b | g_f | g_b | o_f | o_b]
    # (PyTorch gate order i,f,g,o; forget gate multiplies c0 = 0 -> dropped).
    def gate(w_ih, b_ih, b_hh, g):
        w_ih = np.asarray(w_ih, np.float32)
        bsum = np.asarray(b_ih, np.float32) + np.asarray(b_hh, np.float32)
        return np.transpose(w_ih[g * H:(g + 1) * H, :]), bsum[g * H:(g + 1) * H]

    i_f, bi_f = gate(params["w_ih_f"], params["b_ih_f"], params["b_hh_f"], 0)
    g_f, bg_f = gate(params["w_ih_f"], params["b_ih_f"], params["b_hh_f"], 2)
    o_f, bo_f = gate(params["w_ih_f"], params["b_ih_f"], params["b_hh_f"], 3)
    i_b, bi_b = gate(params["w_ih_b"], params["b_ih_b"], params["b_hh_b"], 0)
    g_b, bg_b = gate(params["w_ih_b"], params["b_ih_b"], params["b_hh_b"], 2)
    o_b, bo_b = gate(params["w_ih_b"], params["b_ih_b"], params["b_hh_b"], 3)
    w_gates_core = np.concatenate([i_f, i_b, g_f, g_b, o_f, o_b], axis=1)   # (NB*F, 6H)
    b_gates = np.concatenate([bi_f, bi_b, bg_f, bg_b, bo_f, bo_b])[None, :]
    # Pad contraction rows to 128 so the matmul consumes the 128-lane `feats`
    # directly (extra feats lanes are exactly 0, extra rows are 0 -> no-op).
    w_gates = np.zeros((LANES, 6 * H), np.float32)
    w_gates[:NB * F, :] = w_gates_core

    w_fc = np.transpose(np.asarray(params["fc_w"], np.float32))      # (2H, C)
    b_fc = np.asarray(params["fc_b"], np.float32)[None, :]           # (1, C)

    return [("w_conv", w_conv), ("b_conv", b_conv),
            ("w_gates", w_gates), ("b_gates", b_gates),
            ("w_fc", w_fc), ("b_fc", b_fc)]


def _assemble_blob(sections):
    """Pad every section to (round8 rows, 128) f32 and stack -> single blob."""
    offs, rows, row = {}, [], 0
    for name, a in sections:
        a = np.asarray(a, np.float32)
        r, c = a.shape
        rp = _round_up(r, 8)                 # keep every section sublane-aligned
        buf = np.zeros((rp, LANES), np.float32)
        buf[:r, :c] = a
        offs[name] = row
        rows.append(buf)
        row += rp
    return jnp.asarray(np.concatenate(rows, axis=0)), offs


# ----------------------------------------------------------------------------
# Builder: pack params once, cache a jitted forward per (B, L) input shape.
# ----------------------------------------------------------------------------
def make_hybrid_poetry_classifier(params, *, cnn_kernel_sizes, lstm_hidden_dim,
                                  matmul_dtype=jnp.bfloat16, batch_tile=None):
    KS = list(cnn_kernel_sizes)
    H = int(lstm_hidden_dim)
    F = int(params["conv_w"][0].shape[0])
    D = int(params["conv_w"][0].shape[1])
    C = int(params["fc_w"].shape[0])
    NB = len(KS)
    assert NB * F <= LANES and 6 * H <= LANES and C <= LANES, (
        "fused single-vreg-wide layout requires n_branches*F, 6*H, C <= 128")

    pads = [(k - 1) // 2 for k in KS]
    P_eff = max(pads)
    K_eff = max(P_eff - p + k for k, p in zip(KS, pads))

    # Heavy (L-independent) parameter packing: host-side, once per param set.
    weight_sections = _pack_weight_sections(
        params, KS, D=D, F=F, H=H, P_eff=P_eff, K_eff=K_eff)

    compiled = {}     # (B, L) -> jitted forward closure over the packed blob

    def _build(B, L):
        l_outs = [L + 2 * p - k + 1 for k, p in zip(KS, pads)]
        assert min(l_outs) >= 1, "seq_len too short for the largest CNN kernel"
        T = max(l_outs)                                   # pooled time extent
        right_pad = max(0, T + K_eff - 1 - (L + P_eff))
        Lp = L + P_eff + right_pad
        apply_mask = any(lo < T for lo in l_outs)         # only even kernel sizes

        # Trace-time constant validity mask, stored as rows of the blob.
        mask = np.zeros((T, LANES), np.float32)
        for bi, lo in enumerate(l_outs):
            mask[:lo, bi * F:(bi + 1) * F] = 1.0
        blob, offs = _assemble_blob(weight_sections + [("mask", mask)])

        if batch_tile is None or batch_tile >= B:
            bt = B                                        # single grid step
        else:
            bt = int(batch_tile)
            assert B % bt == 0 and bt % 8 == 0, (
                "batch_tile must divide B and be a multiple of 8")

        kernel = _build_kernel(B=bt, T=T, K_eff=K_eff, D=D, H=H, offs=offs,
                               mm_dtype=matmul_dtype, apply_mask=apply_mask)
        grid = (B // bt,)
        blob_shape = blob.shape

        @jax.jit
        def fwd(x):
            # Single global pad (left P_eff, right up to T + K_eff - 1).
            x_pad = jnp.pad(x.astype(jnp.float32),
                            ((0, 0), (P_eff, right_pad), (0, 0)))
            out = pl.pallas_call(
                kernel,
                out_shape=jax.ShapeDtypeStruct((B, LANES), jnp.float32),
                grid=grid,
                in_specs=[pl.BlockSpec((bt, Lp, D), lambda i: (i, 0, 0)),
                          pl.BlockSpec(blob_shape, lambda i: (0, 0))],
                out_specs=pl.BlockSpec((bt, LANES), lambda i: (i, 0)),
                compiler_params=pltpu.CompilerParams(
                    dimension_semantics=("parallel",)),
            )(x_pad, blob)
            return out[:, :C]

        return fwd

    def forward(x):
        B, L, Din = x.shape
        assert Din == D, f"expected input_dim={D}, got {Din}"
        key = (B, L)
        if key not in compiled:
            compiled[key] = _build(B, L)
        return compiled[key](x)

    return forward


# ----------------------------------------------------------------------------
# Pure-JAX reference (lax conv + explicit LSTM cell) for correctness check.
# ----------------------------------------------------------------------------
def reference_forward(x, params, *, cnn_kernel_sizes, lstm_hidden_dim):
    H = lstm_hidden_dim
    feats = []
    for ksz, w, b in zip(cnn_kernel_sizes, params["conv_w"], params["conv_b"]):
        p = (ksz - 1) // 2
        conv = jax.lax.conv_general_dilated(
            jnp.transpose(x, (0, 2, 1)), w, window_strides=(1,),
            padding=[(p, p)], dimension_numbers=("NCH", "OIH", "NCH"))
        conv = conv + b[None, :, None]
        feats.append(jnp.max(jnp.maximum(conv, 0.0), axis=2))
    feats = jnp.concatenate(feats, axis=1)

    def lstm_dir(w_ih, b_ih, b_hh):
        g = feats @ jnp.transpose(w_ih) + b_ih + b_hh
        i = jax.nn.sigmoid(g[:, 0:H])
        gg = jnp.tanh(g[:, 2 * H:3 * H])
        o = jax.nn.sigmoid(g[:, 3 * H:4 * H])
        return o * jnp.tanh(i * gg)

    h = jnp.concatenate(
        [lstm_dir(params["w_ih_f"], params["b_ih_f"], params["b_hh_f"]),
         lstm_dir(params["w_ih_b"], params["b_ih_b"], params["b_hh_b"])],
        axis=-1)
    return h @ jnp.transpose(params["fc_w"]) + params["fc_b"]


# ----------------------------------------------------------------------------
if __name__ == "__main__":
    # Model config (matches HybridPoetryClassifier(__init__) shapes)
    B, L, D = 2, 8, 32           # batch, seq_len, input_dim
    F = 8                        # cnn_filters
    KS = [2, 3, 5]               # cnn_kernel_sizes (even + odd)
    H = 16                       # lstm_hidden_dim
    C = 5                        # num_classes
    lstm_in = len(KS) * F        # 24

    key = jax.random.PRNGKey(0)
    ks = iter(jax.random.split(key, 32))

    def nrm(shape, scale=0.1):
        return scale * jax.random.normal(next(ks), shape, dtype=jnp.float32)

    params = {
        "conv_w": [nrm((F, D, k)) for k in KS],     # Conv1d weight (F, D, k)
        "conv_b": [nrm((F,)) for _ in KS],
        "w_ih_f": nrm((4 * H, lstm_in)),            # LSTM fwd weight_ih_l0
        "b_ih_f": nrm((4 * H,)),
        "b_hh_f": nrm((4 * H,)),
        "w_ih_b": nrm((4 * H, lstm_in)),            # LSTM bwd weight_ih_l0_rev
        "b_ih_b": nrm((4 * H,)),
        "b_hh_b": nrm((4 * H,)),
        "fc_w": nrm((C, 2 * H)),                    # Linear weight (C, 2H)
        "fc_b": nrm((C,)),
    }

    x = jax.random.normal(next(ks), (B, L, D), dtype=jnp.float32)

    ref = jax.block_until_ready(
        reference_forward(x, params, cnn_kernel_sizes=KS, lstm_hidden_dim=H))

    # f32 MXU operands (bit-for-bit-ish check)
    fwd_f32 = make_hybrid_poetry_classifier(
        params, cnn_kernel_sizes=KS, lstm_hidden_dim=H,
        matmul_dtype=jnp.float32)
    logits = jax.block_until_ready(fwd_f32(x))
    assert logits.shape == (B, C), logits.shape
    assert jnp.allclose(logits, ref, atol=1e-3, rtol=1e-3), (
        float(jnp.max(jnp.abs(logits - ref))))

    # Default bf16 MXU operands (all of v5e/v6e/v7x); biases/activations stay f32.
    fwd_bf16 = make_hybrid_poetry_classifier(
        params, cnn_kernel_sizes=KS, lstm_hidden_dim=H)   # matmul_dtype=bf16
    logits_bf16 = jax.block_until_ready(fwd_bf16(x))
    assert jnp.allclose(logits_bf16, ref, atol=3e-2, rtol=3e-2), (
        float(jnp.max(jnp.abs(logits_bf16 - ref))))

    # Second call exercises the cached per-shape jitted path (no repacking).
    _ = jax.block_until_ready(fwd_bf16(x))

    print("KERNEL_OK")
</pallas_src>

<mosaic_0001>
module attributes {stable_mosaic.version = 11 : i64} {
  func.func @kernel(%arg0: i32, %arg1: memref<2x12x32xf32, #tpu.memory_space<vmem>>, %arg2: memref<352x128xf32, #tpu.memory_space<vmem>>, %arg3: memref<2x128xf32, #tpu.memory_space<vmem>>) attributes {dimension_semantics = [#tpu.dimension_semantics<parallel>], iteration_bounds = array<i64: 1>, scalar_prefetch = 0 : i64, scratch_operands = 0 : i64, tpu.core_type = #tpu.core_type<tc>, window_params = [{transform_indices = @transform_0, window_bounds = array<i64: 2, 12, 32>}, {pipeline_mode = #tpu.pipeline_mode<synchronous>, transform_indices = @transform_1, window_bounds = array<i64: 352, 128>}, {transform_indices = @transform_2, window_bounds = array<i64: 2, 128>}]} {
    %c0 = arith.constant 0 : index
    %c0_0 = arith.constant 0 : index
    %c0_1 = arith.constant 0 : index
    %0 = vector.load %arg1[%c0, %c0_0, %c0_1] : memref<2x12x32xf32, #tpu.memory_space<vmem>>, vector<2x8x32xf32>
    %1 = vector.shape_cast %0 : vector<2x8x32xf32> to vector<16x32xf32>
    %c0_2 = arith.constant 0 : index
    %c0_3 = arith.constant 0 : index
    %2 = vector.load %arg2[%c0_2, %c0_3] : memref<352x128xf32, #tpu.memory_space<vmem>>, vector<32x128xf32>
    %cst = arith.constant dense<0.000000e+00> : vector<16x128xf32>
    %3 = tpu.matmul %1, %2, %cst {dimension_numbers = #tpu.dot_dimension_numbers<[1], [0], [0], [1], [0, 0, 1, 1], [], []>} : vector<16x32xf32>, vector<32x128xf32>, vector<16x128xf32> -> vector<16x128xf32>
    %c0_4 = arith.constant 0 : index
    %c1 = arith.constant 1 : index
    %c0_5 = arith.constant 0 : index
    %4 = vector.load %arg1[%c0_4, %c1, %c0_5] : memref<2x12x32xf32, #tpu.memory_space<vmem>>, vector<2x8x32xf32>
    %5 = vector.shape_cast %4 : vector<2x8x32xf32> to vector<16x32xf32>
    %c32 = arith.constant 32 : index
    %c0_6 = arith.constant 0 : index
    %6 = vector.load %arg2[%c32, %c0_6] : memref<352x128xf32, #tpu.memory_space<vmem>>, vector<32x128xf32>
    %cst_7 = arith.constant dense<0.000000e+00> : vector<16x128xf32>
    %7 = tpu.matmul %5, %6, %cst_7 {dimension_numbers = #tpu.dot_dimension_numbers<[1], [0], [0], [1], [0, 0, 1, 1], [], []>} : vector<16x32xf32>, vector<32x128xf32>, vector<16x128xf32> -> vector<16x128xf32>
    %8 = arith.addf %3, %7 : vector<16x128xf32>
    %c0_8 = arith.constant 0 : index
    %c2 = arith.constant 2 : index
    %c0_9 = arith.constant 0 : index
    %9 = vector.load %arg1[%c0_8, %c2, %c0_9] : memref<2x12x32xf32, #tpu.memory_space<vmem>>, vector<2x8x32xf32>
    %10 = vector.shape_cast %9 : vector<2x8x32xf32> to vector<16x32xf32>
    %c64 = arith.constant 64 : index
    %c0_10 = arith.constant 0 : index
    %11 = vector.load %arg2[%c64, %c0_10] : memref<352x128xf32, #tpu.memory_space<vmem>>, vector<32x128xf32>
    %cst_11 = arith.constant dense<0.000000e+00> : vector<16x128xf32>
    %12 = tpu.matmul %10, %11, %cst_11 {dimension_numbers = #tpu.dot_dimension_numbers<[1], [0], [0], [1], [0, 0, 1, 1], [], []>} : vector<16x32xf32>, vector<32x128xf32>, vector<16x128xf32> -> vector<16x128xf32>
    %13 = arith.addf %8, %12 : vector<16x128xf32>
    %c0_12 = arith.constant 0 : index
    %c3 = arith.constant 3 : index
    %c0_13 = arith.constant 0 : index
    %14 = vector.load %arg1[%c0_12, %c3, %c0_13] : memref<2x12x32xf32, #tpu.memory_space<vmem>>, vector<2x8x32xf32>
    %15 = vector.shape_cast %14 : vector<2x8x32xf32> to vector<16x32xf32>
    %c96 = arith.constant 96 : index
    %c0_14 = arith.constant 0 : index
    %16 = vector.load %arg2[%c96, %c0_14] : memref<352x128xf32, #tpu.memory_space<vmem>>, vector<32x128xf32>
    %cst_15 = arith.constant dense<0.000000e+00> : vector<16x128xf32>
    %17 = tpu.matmul %15, %16, %cst_15 {dimension_numbers = #tpu.dot_dimension_numbers<[1], [0], [0], [1], [0, 0, 1, 1], [], []>} : vector<16x32xf32>, vector<32x128xf32>, vector<16x128xf32> -> vector<16x128xf32>
    %18 = arith.addf %13, %17 : vector<16x128xf32>
    %c0_16 = arith.constant 0 : index
    %c4 = arith.constant 4 : index
    %c0_17 = arith.constant 0 : index
    %19 = vector.load %arg1[%c0_16, %c4, %c0_17] : memref<2x12x32xf32, #tpu.memory_space<vmem>>, vector<2x8x32xf32>
    %20 = vector.shape_cast %19 : vector<2x8x32xf32> to vector<16x32xf32>
    %c128 = arith.constant 128 : index
    %c0_18 = arith.constant 0 : index
    %21 = vector.load %arg2[%c128, %c0_18] : memref<352x128xf32, #tpu.memory_space<vmem>>, vector<32x128xf32>
    %cst_19 = arith.constant dense<0.000000e+00> : vector<16x128xf32>
    %22 = tpu.matmul %20, %21, %cst_19 {dimension_numbers = #tpu.dot_dimension_numbers<[1], [0], [0], [1], [0, 0, 1, 1], [], []>} : vector<16x32xf32>, vector<32x128xf32>, vector<16x128xf32> -> vector<16x128xf32>
    %23 = arith.addf %18, %22 : vector<16x128xf32>
    %c160 = arith.constant 160 : index
    %c0_20 = arith.constant 0 : index
    %24 = vector.load %arg2[%c160, %c0_20] : memref<352x128xf32, #tpu.memory_space<vmem>>, vector<1x128xf32>
    %25 = vector.broadcast %24 : vector<1x128xf32> to vector<16x128xf32>
    %26 = arith.addf %23, %25 : vector<16x128xf32>
    %cst_21 = arith.constant 0.000000e+00 : f32
    %27 = vector.broadcast %cst_21 : f32 to vector<16x128xf32>
    %28 = arith.maximumf %26, %27 : vector<16x128xf32>
    %29 = vector.shape_cast %28 : vector<16x128xf32> to vector<2x8x128xf32>
    %c344 = arith.constant 344 : index
    %c0_22 = arith.constant 0 : index
    %30 = vector.load %arg2[%c344, %c0_22] : memref<352x128xf32, #tpu.memory_space<vmem>>, vector<8x128xf32>
    %31 = vector.shape_cast %30 : vector<8x128xf32> to vector<1x8x128xf32>
    %32 = vector.broadcast %31 : vector<1x8x128xf32> to vector<2x8x128xf32>
    %33 = arith.mulf %29, %32 : vector<2x8x128xf32>
    %cst_23 = arith.constant dense<0xFF800000> : vector<2x128xf32>
    %34 = vector.multi_reduction <maximumf>, %33, %cst_23 [1] : vector<2x8x128xf32> to vector<2x128xf32>
    %c168 = arith.constant 168 : index
    %c0_24 = arith.constant 0 : index
    %35 = vector.load %arg2[%c168, %c0_24] : memref<352x128xf32, #tpu.memory_space<vmem>>, vector<128x128xf32>
    %c296 = arith.constant 296 : index
    %c0_25 = arith.constant 0 : index
    %36 = vector.load %arg2[%c296, %c0_25] : memref<352x128xf32, #tpu.memory_space<vmem>>, vector<1x128xf32>
    %cst_26 = arith.constant dense<0.000000e+00> : vector<2x128xf32>
    %37 = tpu.matmul %34, %35, %cst_26 {dimension_numbers = #tpu.dot_dimension_numbers<[1], [0], [0], [1], [0, 0, 1, 1], [], []>} : vector<2x128xf32>, vector<128x128xf32>, vector<2x128xf32> -> vector<2x128xf32>
    %38 = vector.broadcast %36 : vector<1x128xf32> to vector<2x128xf32>
    %39 = arith.addf %37, %38 : vector<2x128xf32>
    %40 = vector.extract_strided_slice %39 {offsets = [0, 0], sizes = [2, 32], strides = [1, 1]} : vector<2x128xf32> to vector<2x32xf32>
    %41 = arith.negf %40 : vector<2x32xf32>
    %42 = math.exp %41 : vector<2x32xf32>
    %cst_27 = arith.constant 1.000000e+00 : f32
    %43 = vector.broadcast %cst_27 : f32 to vector<2x32xf32>
    %44 = arith.addf %43, %42 : vector<2x32xf32>
    %45 = arith.divf %43, %44 : vector<2x32xf32>
    %46 = vector.extract_strided_slice %39 {offsets = [0, 32], sizes = [2, 32], strides = [1, 1]} : vector<2x128xf32> to vector<2x32xf32>
    %47 = math.tanh %46 : vector<2x32xf32>
    %48 = vector.extract_strided_slice %39 {offsets = [0, 64], sizes = [2, 32], strides = [1, 1]} : vector<2x128xf32> to vector<2x32xf32>
    %49 = arith.negf %48 : vector<2x32xf32>
    %50 = math.exp %49 : vector<2x32xf32>
    %cst_28 = arith.constant 1.000000e+00 : f32
    %51 = vector.broadcast %cst_28 : f32 to vector<2x32xf32>
    %52 = arith.addf %51, %50 : vector<2x32xf32>
    %53 = arith.divf %51, %52 : vector<2x32xf32>
    %54 = arith.mulf %45, %47 : vector<2x32xf32>
    %55 = math.tanh %54 : vector<2x32xf32>
    %56 = arith.mulf %53, %55 : vector<2x32xf32>
    %c304 = arith.constant 304 : index
    %c0_29 = arith.constant 0 : index
    %57 = vector.load %arg2[%c304, %c0_29] : memref<352x128xf32, #tpu.memory_space<vmem>>, vector<32x128xf32>
    %c336 = arith.constant 336 : index
    %c0_30 = arith.constant 0 : index
    %58 = vector.load %arg2[%c336, %c0_30] : memref<352x128xf32, #tpu.memory_space<vmem>>, vector<1x128xf32>
    %cst_31 = arith.constant dense<0.000000e+00> : vector<2x128xf32>
    %59 = tpu.matmul %56, %57, %cst_31 {dimension_numbers = #tpu.dot_dimension_numbers<[1], [0], [0], [1], [0, 0, 1, 1], [], []>} : vector<2x32xf32>, vector<32x128xf32>, vector<2x128xf32> -> vector<2x128xf32>
    %60 = vector.broadcast %58 : vector<1x128xf32> to vector<2x128xf32>
    %61 = arith.addf %59, %60 : vector<2x128xf32>
    %c0_32 = arith.constant 0 : index
    %c0_33 = arith.constant 0 : index
    %62 = vector.load %arg3[%c0_32, %c0_33] : memref<2x128xf32, #tpu.memory_space<vmem>>, vector<2x128xf32>
    tpu.vector_store %arg3[%c0_32, %c0_33], %61 {strides = array<i32>} : memref<2x128xf32, #tpu.memory_space<vmem>>, vector<2x128xf32>,
    return
  }
  func.func @transform_0(%arg0: i32) -> (i32, i32, i32) {
    %c0_i32 = arith.constant 0 : i32
    %c0_i32_0 = arith.constant 0 : i32
    %c0_i32_1 = arith.constant 0 : i32
    return %arg0, %c0_i32, %c0_i32_0 : i32, i32, i32
  }
  func.func @transform_1(%arg0: i32) -> (i32, i32) {
    %c0_i32 = arith.constant 0 : i32
    %c0_i32_0 = arith.constant 0 : i32
    %c0_i32_1 = arith.constant 0 : i32
    return %c0_i32, %c0_i32_0 : i32, i32
  }
  func.func @transform_2(%arg0: i32) -> (i32, i32) {
    %c0_i32 = arith.constant 0 : i32
    %c0_i32_0 = arith.constant 0 : i32
    return %arg0, %c0_i32 : i32, i32
  }
}

</mosaic_0001>

<bundles_post_ra>
// kernel: fwd.1
= control target key start
LH: loop header
LB: loop body
LE: loop exit
PB: predicated region body
PF: predicated region fallthrough
CT: control target
= control target key end

     0   :  { %7 = vsyncpa [#allocation3], 0  ;;  %s503_s0 = inlined_call_operand.vmem [shape: f32[2,12,32], index: 0, kind: input, shape index: {}]   ;;  %s504_s1 = inlined_call_operand.hbm [shape: f32[352,128], index: 1, kind: input, shape index: {}]   ;;  %s505_s2 = inlined_call_operand.hbm [shape: f32[2,128], index: 2, kind: output, shape index: {}]  }
   0x1   :  { %8 = vsyncpa [#allocation4], 0  ;;  %s15_s11 = sshll.u32 %s504_s1, 4  ;;  %s435_s12 = smov [#allocation2]   ;;  %s16_s11 = int_to_ptr.hbm [resolvable:$true] %s15_s11 }
   0x2   :  { %s17_s13 = sshll.u32 %s435_s12, 4  ;;  %s436_s14 = smov 128   ;;  %s18_s13 = int_to_ptr.vmem [resolvable:$true] %s17_s13 }
   0x3   :  { %s437_s15 = smov 8  }
   0x4   :  { %23 = dma.hbm_to_vmem [thread:$0]  %s16_s11, 5632, %s18_s13, [#allocation3], %s436_s14, %s436_s14, %s437_s15  }
   0x5   :  { %431 = dma.done.wait [#allocation3], 5632  }
   0x6   :  { %432 = vsyncadd [#allocation3], 4294961664  ;;  %v33_v0 = vld [vmem:[#allocation2 + $0x18] sm:$0xff]  ;;  %v32_v1 = vld [vmem:[#allocation2 + $0x10] sm:$0xff]  ;;  %vm40_vm0 = vcmask 261120   ;;  %vm251_vm1 = vcmask 1041409  }
   0x7   :  { %v104_v2 = vld [vmem:[#allocation2 + $0x58] sm:$0xff]  ;;  %88 = vmatpush.msra.mxu3 %v33_v0  ;;  %v103_v3 = vld [vmem:[#allocation2 + $0x50] sm:$0xff]  ;;  %v31_v5 = vld [vmem:[#allocation2 + $0x8] sm:$0xff]  ;;  %s439_s7 = smov 64   ;;  %s440_s8 = smov [#allocation5]  }
   0x8   :  { %123 = vmatpush.msra.mxu2 %v104_v2  ;;  %v39_v4 = vld [vmem:[#allocation2 + $0x38] sm:$0xff]  ;;  %v102_v6 = vld [vmem:[#allocation2 + $0x48] sm:$0xff]  ;;  %v38_v7 = vld [vmem:[#allocation2 + $0x30] sm:$0xff]  ;;  %s342_s9 = sshll.u32 %s440_s8, 4  ;;  %s344_s12 = sshll.u32 %s505_s2, 4  ;;  %s343_s9 = int_to_ptr.vmem [resolvable:$true] %s342_s9  ;;  %s345_s12 = int_to_ptr.hbm [resolvable:$true] %s344_s12 }
   0x9   :  { %59 = vmatpush.msra.mxu0 %v39_v4  ;;  %89 = vmatpush.msra.mxu3 %v32_v1  ;;  %v30_v8 = vld [vmem:[#allocation2] sm:$0xff]  ;;  %v37_v10 = vld [vmem:[#allocation2 + $0x28] sm:$0xff]  ;;  %v141_v13 = vld [vmem:[#allocation2 + $0x78] sm:$0xff] }
   0xa   :  { %124 = vmatpush.msra.mxu2 %v103_v3  ;;  %v101_v9 = vld [vmem:[#allocation2 + $0x40] sm:$0xff]  ;;  %v140_v16 = vld [vmem:[#allocation2 + $0x70] sm:$0xff]  ;;  %v178_v17 = vld [vmem:[#allocation2 + $0x98] sm:$0xff] }
   0xb   :  { %60 = vmatpush.msra.mxu0 %v38_v7  ;;  %90 = vmatpush.msra.mxu3 %v31_v5  ;;  %v28_v11 = vld [vmem:[%s503_s0] sm:$0xff]  ;;  %v139_v18 = vld [vmem:[#allocation2 + $0x68] sm:$0xff]  ;;  %v177_v19 = vld [vmem:[#allocation2 + $0x90] sm:$0xff] }
   0xc   :  { %125 = vmatpush.msra.mxu2 %v102_v6  ;;  %v99_v12 = vld [vmem:[%s503_s0 + $0x2] sm:$0xff]  ;;  %v29_v22 = vld [vmem:[%s503_s0 + $0x10] sm:$0xff]  ;;  %v245_v31 = vld [vmem:[#allocation2 + $0x118] sm:$0xff] }
   0xd   :  { %61 = vmatpush.msra.mxu0 %v37_v10  ;;  %v36_v14 = vld [vmem:[#allocation2 + $0x20] sm:$0xff]  ;;  %91 = vmatpush.msra.mxu3 %v30_v8  ;;  %v176_v21 = vld [vmem:[#allocation2 + $0x88] sm:$0xff]  ;;  %v100_v23 = vld [vmem:[%s503_s0 + $0x12] sm:$0xff] }
   0xe   :  { %126 = vmatpush.msra.mxu2 %v101_v9  ;;  %v34_v15 = vld [vmem:[%s503_s0 + $0x1] sm:$0xff]  ;;  %356 = vmatmul.msk.f32.vlgmr.msra.gmra.mxu3 %vm40_vm0, %v28_v11  ;;  %v35_v25 = vld [vmem:[%s503_s0 + $0x11] sm:$0xff]  ;;  %v372_v56 = vld [vmem:[#allocation2 + $0xa0] ss:$0 sm:$0xff] }
   0xf   :  { %358 = vmatmul.msk.f32.vlgmr.msra.gmra.mxu2 %vm40_vm0, %v99_v12  ;;  %160 = vmatpush.msrb.mxu3 %v141_v13  ;;  %v138_v20 = vld [vmem:[#allocation2 + $0x60] sm:$0xff]  ;;  %v137_v28 = vld [vmem:[%s503_s0 + $0x13] sm:$0xff]  ;;  %v243_v33 = vld [vmem:[#allocation2 + $0x108] sm:$0xff] }
  0x10   :  { %62 = vmatpush.msra.mxu0 %v36_v14  ;;  %v175_v24 = vld [vmem:[#allocation2 + $0x80] sm:$0xff]  ;;  %v174_v29 = vld [vmem:[%s503_s0 + $0x14] sm:$0xff]  ;;  %v239_v38 = vld [vmem:[#allocation2 + $0xe8] sm:$0xff] }
  0x11   :  { %354 = vmatmul.msk.f32.vlgmr.msra.gmra.mxu0 %vm40_vm0, %v34_v15  ;;  %161 = vmatpush.msrb.mxu3 %v140_v16  ;;  %v136_v26 = vld [vmem:[%s503_s0 + $0x3] sm:$0xff]  ;;  %v244_v32 = vld [vmem:[#allocation2 + $0x110] sm:$0xff]  ;;  %v241_v35 = vld [vmem:[#allocation2 + $0xf8] sm:$0xff] }
  0x12   :  { %197 = vmatpush.msrb.mxu0 %v178_v17  ;;  %v173_v27 = vld [vmem:[%s503_s0 + $0x4] sm:$0xff]  ;;  %v240_v37 = vld [vmem:[#allocation2 + $0xf0] sm:$0xff]  ;;  %v237_v41 = vld [vmem:[#allocation2 + $0xd8] sm:$0xff]  ;;  %s438_s0 = smov 96  }
  0x13   :  { %162 = vmatpush.msrb.mxu3 %v139_v18  ;;  %v246_v30 = vld [vmem:[#allocation2 + $0x120] sm:$0xff]  ;;  %v236_v42 = vld [vmem:[#allocation2 + $0xd0] sm:$0xff]  ;;  %v235_v43 = vld [vmem:[#allocation2 + $0xc8] sm:$0xff] }
  0x14   :  { %198 = vmatpush.msrb.mxu0 %v177_v19  ;;  %254 = vmatpush.msra.mxu1 %v246_v30  ;;  %v242_v34 = vld [vmem:[#allocation2 + $0x100] sm:$0xff]  ;;  %v233_v47 = vld [vmem:[#allocation2 + $0xb8] sm:$0xff]  ;;  %v232_v49 = vld [vmem:[#allocation2 + $0xb0] sm:$0xff] }
  0x15   :  { %163 = vmatpush.msrb.mxu3 %v138_v20  ;;  %v238_v40 = vld [vmem:[#allocation2 + $0xe0] sm:$0xff]  ;;  %v231_v51 = vld [vmem:[#allocation2 + $0xa8] sm:$0xff]  ;;  %v216_v61 = vld [vmem:[#allocation2 + $0x158] sm:$0xff] }
  0x16   :  { %199 = vmatpush.msrb.mxu0 %v176_v21  ;;  %357 = vmatmul.msk.f32.gmra.mxu3 %vm40_vm0, %v29_v22  ;;  %v234_v45 = vld [vmem:[#allocation2 + $0xc0] sm:$0xff]  ;;  %v373_v21 = vld [vmem:[#allocation2 + $0x128] ss:$0 sm:$0xff] }
  0x17   :  { %359 = vmatmul.msk.f32.gmra.mxu2 %vm40_vm0, %v100_v23  ;;  %255 = vmatpush.msra.mxu1 %v245_v31 }
  0x18   :  { %200 = vmatpush.msrb.mxu0 %v175_v24 }
  0x19   :  { %355 = vmatmul.msk.f32.gmra.mxu0 %vm40_vm0, %v35_v25  ;;  %256 = vmatpush.msra.mxu1 %v244_v32 }
  0x1b   :  { %257 = vmatpush.msra.mxu1 %v243_v33 }
  0x1d   :  { %258 = vmatpush.msra.mxu1 %v242_v34 }
  0x1e   :  { %360 = vmatmul.msk.f32.vlgmr.msrb.gmra.mxu3 %vm40_vm0, %v136_v26 }
  0x1f   :  { %259 = vmatpush.msra.mxu1 %v241_v35 }
  0x21   :  { %362 = vmatmul.msk.f32.vlgmr.msrb.gmra.mxu0 %vm40_vm0, %v173_v27  ;;  %260 = vmatpush.msra.mxu1 %v240_v37 }
  0x23   :  { %261 = vmatpush.msra.mxu1 %v239_v38 }
  0x25   :  { %262 = vmatpush.msra.mxu1 %v238_v40 }
  0x26   :  { %361 = vmatmul.msk.f32.gmra.mxu3 %vm40_vm0, %v137_v28 }
  0x27   :  { %263 = vmatpush.msra.mxu1 %v237_v41  ;;  %v308_v41 = vld [vmem:[#allocation2 + $0x148] sm:$0xff] }
  0x28   :  { %328 = vmatpush.msrb.mxu2 %v308_v41 }
  0x29   :  { %363 = vmatmul.msk.f32.gmra.mxu0 %vm40_vm0, %v174_v29  ;;  %264 = vmatpush.msra.mxu1 %v236_v42  ;;  %v307_v42 = vld [vmem:[#allocation2 + $0x140] sm:$0xff] }
  0x2a   :  { %329 = vmatpush.msrb.mxu2 %v307_v42 }
  0x2b   :  { %265 = vmatpush.msra.mxu1 %v235_v43  ;;  %v306_v43 = vld [vmem:[#allocation2 + $0x138] sm:$0xff] }
  0x2c   :  { %330 = vmatpush.msrb.mxu2 %v306_v43 }
  0x2d   :  { %266 = vmatpush.msra.mxu1 %v234_v45 }
  0x2f   :  { %267 = vmatpush.msra.mxu1 %v233_v47 }
  0x31   :  { %268 = vmatpush.msra.mxu1 %v232_v49 }
  0x33   :  { %269 = vmatpush.msra.mxu1 %v231_v51 }
  0x8e   :  { %v64_v36 = vpop.f32.mrf.mxu0 }
  0x91   :  { %v93_v39 = vpop.f32.mrf.mxu3 }
  0x92   :  { %v128_v48 = vpop.f32.mrf.mxu2  ;;  %v94_v50 = vadd.f32 %v93_v39, %v64_v36 }
  0x94   :  { %v134_v53 = vadd.f32 %v128_v48, %v94_v50  ;;  %v374_v48 = vld [vmem:[#allocation2 + $0x150] ss:$0 sm:$0xff] }
  0x96   :  { %v67_v44 = vpop.f32.mrf.mxu0 }
  0x99   :  { %v96_v46 = vpop.f32.mrf.mxu3 }
  0x9a   :  { %v97_v57 = vadd.f32 %v96_v46, %v67_v44  ;;  %v131_v59 = vpop.f32.mrf.mxu2  ;;  %v305_v44 = vld [vmem:[#allocation2 + $0x130] sm:$0xff] }
  0x9b   :  { %331 = vmatpush.msrb.mxu2 %v305_v44 }
  0x9c   :  { %v135_v62 = vadd.f32 %v131_v59, %v97_v57 }
  0x9e   :  { %v202_v52 = vpop.f32.mrf.mxu0 }
  0xa1   :  { %v165_v54 = vpop.f32.mrf.mxu3 }
  0xa2   :  { %v171_v55 = vadd.f32 %v165_v54, %v134_v53 }
  0xa4   :  { %v208_v58 = vadd.f32 %v202_v52, %v171_v55 }
  0xa6   :  { %v212_v60 = vadd.f32 %v372_v56, %v208_v58  ;;  %v205_v1 = vpop.f32.mrf.mxu0 }
  0xa8   :  { %v214_v63 = vmax.f32 %v212_v60, 0.0 }
  0xa9   :  { %v168_v0 = vpop.f32.mrf.mxu3 }
  0xaa   :  { %v217_v2 = vmul.f32 %v216_v61, %v214_v63  ;;  %v172_v3 = vadd.f32 %v168_v0, %v135_v62 }
  0xac   :  { %v219_v4 = vrot.slane %v217_v2, 4  ;;  %v209_v5 = vadd.f32 %v205_v1, %v172_v3 }
  0xae   :  { %v220_v6 = vmax.f32 %v217_v2, %v219_v4  ;;  %v213_v7 = vadd.f32 %v372_v56, %v209_v5 }
  0xb0   :  { %v215_v8 = vmax.f32 %v213_v7, 0.0  ;;  %v221_v10 = vrot.slane %v220_v6, 2 }
  0xb2   :  { %v218_v9 = vmul.f32 %v216_v61, %v215_v8  ;;  %v222_v13 = vmax.f32 %v220_v6, %v221_v10 }
  0xb4   :  { %v225_v11 = vrot.slane %v218_v9, 4  ;;  %v223_v15 = vrot.slane %v222_v13, 1 }
  0xb6   :  { %v226_v12 = vmax.f32 %v218_v9, %v225_v11  ;;  %v224_v18 = vmax.f32 %v222_v13, %v223_v15 }
  0xb8   :  { %v227_v14 = vrot.slane %v226_v12, 2 }
  0xba   :  { %v228_v16 = vmax.f32 %v226_v12, %v227_v14 }
  0xbc   :  { %v229_v17 = vrot.slane %v228_v16, 1 }
  0xbe   :  { %v230_v19 = vmax.f32 %v228_v16, %v229_v17 }
  0xc0   :  { %v252_v20 = vsel %vm251_vm1, %v230_v19, %v224_v18 }
  0xc1   :  { %270 = vmatmul.f32.vlgmr.msra.gmra.mxu1 %v252_v20 }
 0x13e   :  { %v271_v22 = vpop.f32.mrf.mxu1 }
 0x13f   :  { %v272_v23 = vadd.f32 %v373_v21, %v271_v22 }
 0x141   :  { %375 = vtanh.f32 %v272_v23  ;;  %v364_v25 = vmul.f32 -1.442695, %v272_v23 }
 0x143   :  { %377 = vpow2.f32 %v364_v25 }
 0x147   :  { %v376_v24 = vpop.eup %375 }
 0x148   :  { %295 = vrot.lane.b32.xlu0 %v376_v24, %s438_s0 }
 0x149   :  { %v378_v26 = vpop.eup %377 }
 0x14a   :  { %v277_v27 = vadd.f32 1.0, %v378_v26 }
 0x14c   :  { %379 = vrcp.f32 %v277_v27  ;;  %v289_v33 = vand.u32 2147483648, %v277_v27  ;;  %vm283_vm3 = vweird.f32 %v277_v27  ;;  %v287_v34 = vand.u32 2147483647, %v277_v27 }
 0x14e   :  { %v290_v36 = vor.u32 1.1754944e-38, %v289_v33  ;;  %vm288_vm5 = vcmp.eq.f32.partialorder %v287_v34, 8.507059e+37 }
 0x152   :  { %v380_v28 = vpop.eup %379 }
 0x153   :  { %v279_v29 = vmul.f32 %v380_v28, %v277_v27  ;;  %vm284_vm2 = vweird.f32 %v380_v28 }
 0x154   :  { %vm285_vm4 = vmor %vm283_vm3, %vm284_vm2 }
 0x155   :  { %v280_v30 = vsub.f32 1.0, %v279_v29 }
 0x157   :  { %v281_v31 = vmul.f32 %v380_v28, %v280_v30 }
 0x159   :  { %v282_v32 = vadd.f32 %v380_v28, %v281_v31 }
 0x15b   :  { %v286_v35 = vsel %vm285_vm4, %v380_v28, %v282_v32 }
 0x15c   :  { %v291_v38 = vsel %vm288_vm5, %v290_v36, %v286_v35 }
 0x1ba   :  { %v296_v37 = vpop.permute.xlu0 %295 }
 0x1bb   :  { %v298_v39 = vmul.f32 %v296_v37, %v291_v38 }
 0x1bd   :  { %381 = vtanh.f32 %v298_v39 }
 0x1c3   :  { %v382_v40 = vpop.eup %381 }
 0x1c4   :  { %301 = vrot.lane.b32.xlu0 %v382_v40, %s439_s7 }
 0x236   :  { %v302_v45 = vpop.permute.xlu0 %301 }
 0x237   :  { %v304_v46 = vmul.f32 %v302_v45, %v291_v38 }
 0x239   :  { %312 = vrot.lane.b32.xlu1 %v304_v46, %s439_s7 }
 0x2ab   :  { %v313_v47 = vpop.permute.xlu1 %312 }
 0x2ac   :  { %365 = vmatmul.msk.f32.vlgmr.msrb.gmra.mxu2 %vm40_vm0, %v313_v47 }
 0x32f   :  { %v333_v49 = vpop.f32.mrf.mxu2 }
 0x330   :  { %v334_v50 = vadd.f32 %v374_v48, %v333_v49 }
 0x332   :  { %336 = vst [vmem:[#allocation5] sm:$0x3] %v334_v50 }
 0x333   :  { %347 = dma.vmem_to_hbm [thread:$0]  %s343_s9, 32, %s345_s12, [#allocation4]  }
 0x334   :  { %433 = dma.done.wait [#allocation4], 32  }
 0x335   :  { %434 = vsyncadd [#allocation4], 4294967264 }
 0x336   :  { %352 = vsyncpa [#allocation3], 1 }
 0x337   :  { %353 = vsyncpa [#allocation4], 1 }

</bundles_post_ra>
